<compile_context>
chip_gen: v5e
topology: v5e:2x2
jax: 0.10.0
libtpu: 0.0.40
codegen_flags: <defaults>
</compile_context>

<pallas_src>
import functools
import math

import jax
import jax.numpy as jnp
from jax.experimental import pallas as pl
from jax.experimental.pallas import tpu as pltpu


# ---------------------------------------------------------------------------
# Helpers.
# ---------------------------------------------------------------------------
def _round_up(x, m):
    return ((x + m - 1) // m) * m


def _feature_tile(f_pad, cap=512):
    """Largest lane-dense (multiple-of-128) tile dividing f_pad, capped."""
    if f_pad <= cap:
        return f_pad
    for c in (512, 384, 256, 128):
        if c <= cap and f_pad % c == 0:
            return c
    return 128


# ---------------------------------------------------------------------------
# Fast path: whole problem in one VMEM block (tiny graphs), pure f32.
# ---------------------------------------------------------------------------
def _gcn_small_kernel(x_ref, adj_ref, w_ref, b_ref, o_ref):
    support = jnp.dot(x_ref[...], w_ref[...], preferred_element_type=jnp.float32)
    out = jnp.dot(adj_ref[...], support, preferred_element_type=jnp.float32)
    o_ref[...] = (out + b_ref[...]).astype(o_ref.dtype)


def _gcn_small(x, adj, weight, bias2d):
    n, in_f = x.shape
    out_f = weight.shape[1]
    return pl.pallas_call(
        _gcn_small_kernel,
        out_shape=jax.ShapeDtypeStruct((n, out_f), jnp.float32),
        in_specs=[
            pl.BlockSpec((n, in_f), lambda: (0, 0)),
            pl.BlockSpec((n, n), lambda: (0, 0)),
            pl.BlockSpec((in_f, out_f), lambda: (0, 0)),
            pl.BlockSpec((1, out_f), lambda: (0, 0)),
        ],
        out_specs=pl.BlockSpec((n, out_f), lambda: (0, 0)),
    )(x, adj, weight, bias2d)


# ---------------------------------------------------------------------------
# Row-block dense matmul:  out = a @ b + bias   (used for the X@W / tmp@W leg)
# K (= a.shape[1]) is small for GCN, so it is not tiled; rows + feature cols
# are tiled, both grid axes fully parallel.
# ---------------------------------------------------------------------------
def _rowblock_kernel(a_ref, b_ref, bias_ref, o_ref):
    acc = jnp.dot(a_ref[...], b_ref[...], preferred_element_type=jnp.float32)
    o_ref[...] = (acc + bias_ref[...]).astype(o_ref.dtype)


def _rowblock_matmul(a, b, bias_row, *, out_dtype):
    m, k_dim = a.shape
    f_pad = b.shape[1]

    rows = min(512, _round_up(m, 8))
    # Keep the double-buffered `a` block modest (v5e scoped VMEM guard).
    while rows > 8 and rows * k_dim * 4 * 2 > 8 * 1024 * 1024:
        rows = max(8, _round_up(rows // 2, 8))
    tf = _feature_tile(f_pad)

    grid = (pl.cdiv(m, rows), f_pad // tf)
    return pl.pallas_call(
        _rowblock_kernel,
        out_shape=jax.ShapeDtypeStruct((m, f_pad), out_dtype),
        grid_spec=pltpu.PrefetchScalarGridSpec(
            num_scalar_prefetch=0,
            grid=grid,
            in_specs=[
                pl.BlockSpec((rows, k_dim), lambda i, j: (i, 0)),
                pl.BlockSpec((k_dim, tf), lambda i, j: (0, j)),
                pl.BlockSpec((1, tf), lambda i, j: (0, j)),
            ],
            out_specs=pl.BlockSpec((rows, tf), lambda i, j: (i, j)),
        ),
        compiler_params=pltpu.CompilerParams(
            dimension_semantics=("parallel", "parallel"),
            vmem_limit_bytes=32 * 1024 * 1024,
        ),
    )(a, b, bias_row)


# ---------------------------------------------------------------------------
# Dominant matmul:  out = adj @ rhs + bias, adj streamed from HBM in f32.
#   rhs: (n_pad_k, f_pad) with rows >= n exactly zero (caller guarantees).
#   Ragged adj columns of the last k tile are masked in-kernel; the bf16 cast
#   of the adj tile also happens in-kernel (no wrapper-side copy of adj).
# ---------------------------------------------------------------------------
def _adj_matmul_kernel(adj_ref, rhs_ref, bias_ref, o_ref, acc_ref, *,
                       n_cols, tk, compute_dtype, mask_k, rhs_resident):
    k = pl.program_id(2)

    @pl.when(k == 0)
    def _():
        acc_ref[...] = jnp.zeros_like(acc_ref)

    adj_blk = adj_ref[...]                      # f32 tile, straight from HBM
    if mask_k:
        # Zero the out-of-range columns of the ragged last k tile. For all
        # other tiles the predicate is all-true; the VPU select is hidden
        # behind the (dominant) adj DMA.
        col = jax.lax.broadcasted_iota(jnp.int32, (1, tk), 1)
        adj_blk = jnp.where(col < (n_cols - k * tk), adj_blk, 0.0)
    adj_blk = adj_blk.astype(compute_dtype)     # in-kernel cast, f32 acc below

    if rhs_resident:
        start = pl.multiple_of(k * tk, 128)
        rhs_blk = rhs_ref[pl.ds(start, tk), :]
    else:
        rhs_blk = rhs_ref[...]

    acc_ref[...] += jnp.dot(adj_blk, rhs_blk, preferred_element_type=jnp.float32)

    @pl.when(k == pl.num_programs(2) - 1)
    def _():
        o_ref[...] = (acc_ref[...] + bias_ref[...]).astype(o_ref.dtype)


def _adj_matmul(adj, rhs, bias_row, *, tm, tk, compute_dtype):
    n = adj.shape[0]
    n_pad_k, f_pad = rhs.shape
    assert n_pad_k % tk == 0

    tn = _feature_tile(f_pad)                  # == f_pad for typical GCN widths
    gi = pl.cdiv(n, tm)
    gj = f_pad // tn
    gk = n_pad_k // tk
    grid = (gi, gj, gk)

    itemsize = jnp.dtype(compute_dtype).itemsize
    # Hold the support/feature panel resident in VMEM when small (fetched once
    # because its block index never changes); otherwise stream (tk, tn) tiles.
    rhs_resident = n_pad_k * tn * itemsize <= 4 * 1024 * 1024
    if rhs_resident:
        rhs_spec = pl.BlockSpec((n_pad_k, tn), lambda i, j, k: (0, j))
    else:
        rhs_spec = pl.BlockSpec((tk, tn), lambda i, j, k: (k, j))

    mask_k = (n % tk) != 0

    kernel = functools.partial(
        _adj_matmul_kernel,
        n_cols=n, tk=tk, compute_dtype=compute_dtype,
        mask_k=mask_k, rhs_resident=rhs_resident,
    )

    cost = pl.CostEstimate(
        flops=2 * n * n * f_pad,
        transcendentals=0,
        bytes_accessed=(
            n * n * 4 * gj                                              # adj stream
            + n_pad_k * f_pad * itemsize * (1 if rhs_resident else gi)  # rhs
            + n * f_pad * 4                                             # output
            + f_pad * 4 * gi * gj                                       # bias
        ),
    )

    return pl.pallas_call(
        kernel,
        out_shape=jax.ShapeDtypeStruct((n, f_pad), jnp.float32),
        grid_spec=pltpu.PrefetchScalarGridSpec(
            num_scalar_prefetch=0,
            grid=grid,
            in_specs=[
                pl.BlockSpec((tm, tk), lambda i, j, k: (i, k)),   # adj f32 tile
                rhs_spec,                                         # support / X
                pl.BlockSpec((1, tn), lambda i, j, k: (0, j)),    # bias tile
            ],
            out_specs=pl.BlockSpec((tm, tn), lambda i, j, k: (i, j)),
            scratch_shapes=[pltpu.VMEM((tm, tn), jnp.float32)],   # f32 accumulator
        ),
        compiler_params=pltpu.CompilerParams(
            dimension_semantics=("parallel", "parallel", "arbitrary"),
            vmem_limit_bytes=32 * 1024 * 1024,
        ),
        cost_estimate=cost,
    )(adj, rhs, bias_row)


# ---------------------------------------------------------------------------
# Tiled path driver.
# ---------------------------------------------------------------------------
def _gcn_tiled(x, adj, weight, bias2d, *, compute_dtype, order):
    n, in_f = x.shape
    out_f = weight.shape[1]

    if order == "auto":
        # Put the smaller feature dim on the dominant N^2 matmul.
        order = "ax_first" if out_f > in_f else "xw_first"

    # Stage-2 tile plan: big tiles (low per-step overhead, less rhs
    # re-streaming), tm capped so the parallel i axis keeps >= 2 tiles
    # (megacore), tk capped so tiny graphs don't over-pad.
    tk = min(2048, _round_up(n, 256))
    tm = min(512, _round_up(n, 8))
    while tm > 128 and pl.cdiv(n, tm) < 2:
        tm = max(128, _round_up(tm // 2, 8))
    n_pad_k = _round_up(n, tk)

    if order == "xw_first":
        # support = X @ W (bf16 stream), out = adj @ support + bias.
        f_pad = _round_up(out_f, 128)
        x_pad = jnp.pad(x, ((0, n_pad_k - n), (0, 0)))         # cheap: N x in_f
        w_pad = jnp.pad(weight, ((0, 0), (0, f_pad - out_f)))
        zero_bias = jnp.zeros((1, f_pad), jnp.float32)
        support = _rowblock_matmul(x_pad, w_pad, zero_bias, out_dtype=compute_dtype)
        b_pad = jnp.pad(bias2d, ((0, 0), (0, f_pad - out_f)))
        out = _adj_matmul(adj, support, b_pad, tm=tm, tk=tk,
                          compute_dtype=compute_dtype)
    else:
        # tmp = adj @ X (bias-free), out = tmp @ W + bias.
        in_pad = _round_up(in_f, 128)
        x_pad = jnp.pad(x, ((0, n_pad_k - n), (0, in_pad - in_f))).astype(compute_dtype)
        zero_bias_in = jnp.zeros((1, in_pad), jnp.float32)
        tmp = _adj_matmul(adj, x_pad, zero_bias_in, tm=tm, tk=tk,
                          compute_dtype=compute_dtype)
        f_pad = _round_up(out_f, 128)
        w_pad = jnp.pad(weight, ((0, in_pad - in_f), (0, f_pad - out_f)))
        b_pad = jnp.pad(bias2d, ((0, 0), (0, f_pad - out_f)))
        out = _rowblock_matmul(tmp, w_pad, b_pad, out_dtype=jnp.float32)

    if f_pad != out_f:
        out = out[:, :out_f]
    return out


# ---------------------------------------------------------------------------
# Public wrapper.
# ---------------------------------------------------------------------------
def graph_convolution(x, adj, weight, bias=None, *,
                      compute_dtype=jnp.bfloat16, order="auto",
                      force_tiled=False):
    """GCN layer forward: adj @ (x @ weight) + bias."""
    n, in_f = x.shape
    out_f = weight.shape[1]
    assert adj.shape == (n, n)
    assert weight.shape == (in_f, out_f)

    x = x.astype(jnp.float32)
    adj = adj.astype(jnp.float32)
    weight = weight.astype(jnp.float32)
    if bias is None:
        bias2d = jnp.zeros((1, out_f), jnp.float32)
    else:
        bias2d = bias.reshape(1, out_f).astype(jnp.float32)

    # Fast path: the entire problem (all operands + output) fits comfortably
    # in one VMEM block -> single ungridded kernel, pure f32.
    fast_bytes = 4 * (n * n + n * in_f + in_f * out_f + n * out_f + out_f)
    if not force_tiled and fast_bytes <= 6 * 1024 * 1024:
        return _gcn_small(x, adj, weight, bias2d)

    return _gcn_tiled(x, adj, weight, bias2d,
                      compute_dtype=compute_dtype, order=order)


if __name__ == "__main__":
    key = jax.random.PRNGKey(0)

    # ------------------------------------------------------------------
    # Test 1: toy problem -> fast path (single block, f32).
    # ------------------------------------------------------------------
    N, IN_F, OUT_F = 64, 32, 128
    k_x, k_adj, k_w, k_b, key = jax.random.split(key, 5)

    # reset_parameters(): uniform(-stdv, stdv) with stdv = 1/sqrt(out_features)
    stdv = 1.0 / math.sqrt(OUT_F)
    weight = jax.random.uniform(k_w, (IN_F, OUT_F), jnp.float32, -stdv, stdv)
    bias = jax.random.uniform(k_b, (OUT_F,), jnp.float32, -stdv, stdv)

    x = jax.random.normal(k_x, (N, IN_F), jnp.float32)
    adj_raw = (jax.random.uniform(k_adj, (N, N)) < 0.2).astype(jnp.float32)
    adj_raw = adj_raw + jnp.eye(N, dtype=jnp.float32)           # self-loops
    adj = adj_raw / jnp.sum(adj_raw, axis=1, keepdims=True)     # row-normalize

    out = graph_convolution(x, adj, weight, bias)
    jax.block_until_ready(out)
    ref = adj @ (x @ weight) + bias
    assert out.shape == (N, OUT_F)
    # tolerance accommodates MXU bf16-pass defaults for f32 matmuls
    assert jnp.allclose(out, ref, atol=5e-3, rtol=5e-3), "fast path mismatch"

    # ------------------------------------------------------------------
    # Test 2: tiled path (ragged shapes -> in-kernel masking), bf16 compute,
    # both association orders.
    # ------------------------------------------------------------------
    N2, IN_F2, OUT_F2 = 320, 48, 192
    k_x, k_adj, k_w, k_b, key = jax.random.split(key, 5)
    stdv2 = 1.0 / math.sqrt(OUT_F2)
    w2 = jax.random.uniform(k_w, (IN_F2, OUT_F2), jnp.float32, -stdv2, stdv2)
    b2 = jax.random.uniform(k_b, (OUT_F2,), jnp.float32, -stdv2, stdv2)
    x2 = jax.random.normal(k_x, (N2, IN_F2), jnp.float32)
    adj2_raw = (jax.random.uniform(k_adj, (N2, N2)) < 0.05).astype(jnp.float32)
    adj2_raw = adj2_raw + jnp.eye(N2, dtype=jnp.float32)
    adj2 = adj2_raw / jnp.sum(adj2_raw, axis=1, keepdims=True)
    ref2 = adj2 @ (x2 @ w2) + b2

    out2a = graph_convolution(x2, adj2, w2, b2, force_tiled=True, order="xw_first")
    out2b = graph_convolution(x2, adj2, w2, b2, force_tiled=True, order="ax_first")
    jax.block_until_ready((out2a, out2b))
    assert out2a.shape == (N2, OUT_F2) and out2b.shape == (N2, OUT_F2)
    assert jnp.allclose(out2a, ref2, atol=1e-2, rtol=1e-2), "tiled xw_first mismatch"
    assert jnp.allclose(out2b, ref2, atol=1e-2, rtol=1e-2), "tiled ax_first mismatch"

    # ------------------------------------------------------------------
    # Test 3: tiled path in full f32 (exercises ragged-tile masking without
    # bf16 fuzz).
    # ------------------------------------------------------------------
    out2c = graph_convolution(x2, adj2, w2, b2, force_tiled=True,
                              compute_dtype=jnp.float32, order="xw_first")
    jax.block_until_ready(out2c)
    assert jnp.allclose(out2c, ref2, atol=5e-3, rtol=5e-3), "tiled f32 mismatch"

    print("KERNEL_OK")
</pallas_src>

<mosaic_0001>
module attributes {stable_mosaic.version = 11 : i64} {
  func.func @_gcn_small_kernel(%arg0: memref<64x32xf32, #tpu.memory_space<vmem>>, %arg1: memref<64x64xf32, #tpu.memory_space<vmem>>, %arg2: memref<32x128xf32, #tpu.memory_space<vmem>>, %arg3: memref<1x128xf32, #tpu.memory_space<vmem>>, %arg4: memref<64x128xf32, #tpu.memory_space<vmem>>) attributes {dimension_semantics = [], scalar_prefetch = 0 : i64, scratch_operands = 0 : i64, tpu.core_type = #tpu.core_type<tc>} {
    %c0 = arith.constant 0 : index
    %c0_0 = arith.constant 0 : index
    %0 = vector.load %arg0[%c0, %c0_0] : memref<64x32xf32, #tpu.memory_space<vmem>>, vector<64x32xf32>
    %c0_1 = arith.constant 0 : index
    %c0_2 = arith.constant 0 : index
    %1 = vector.load %arg2[%c0_1, %c0_2] : memref<32x128xf32, #tpu.memory_space<vmem>>, vector<32x128xf32>
    %cst = arith.constant dense<0.000000e+00> : vector<64x128xf32>
    %2 = tpu.matmul %0, %1, %cst {dimension_numbers = #tpu.dot_dimension_numbers<[1], [0], [0], [1], [0, 0, 1, 1], [], []>} : vector<64x32xf32>, vector<32x128xf32>, vector<64x128xf32> -> vector<64x128xf32>
    %c0_3 = arith.constant 0 : index
    %c0_4 = arith.constant 0 : index
    %3 = vector.load %arg1[%c0_3, %c0_4] : memref<64x64xf32, #tpu.memory_space<vmem>>, vector<64x64xf32>
    %cst_5 = arith.constant dense<0.000000e+00> : vector<64x128xf32>
    %4 = tpu.matmul %3, %2, %cst_5 {dimension_numbers = #tpu.dot_dimension_numbers<[1], [0], [0], [1], [0, 0, 1, 1], [], []>} : vector<64x64xf32>, vector<64x128xf32>, vector<64x128xf32> -> vector<64x128xf32>
    %c0_6 = arith.constant 0 : index
    %c0_7 = arith.constant 0 : index
    %5 = vector.load %arg3[%c0_6, %c0_7] : memref<1x128xf32, #tpu.memory_space<vmem>>, vector<1x128xf32>
    %6 = vector.broadcast %5 : vector<1x128xf32> to vector<64x128xf32>
    %7 = arith.addf %4, %6 : vector<64x128xf32>
    %c0_8 = arith.constant 0 : index
    %c0_9 = arith.constant 0 : index
    %8 = vector.load %arg4[%c0_8, %c0_9] : memref<64x128xf32, #tpu.memory_space<vmem>>, vector<64x128xf32>
    tpu.vector_store %arg4[%c0_8, %c0_9], %7 {strides = array<i32>} : memref<64x128xf32, #tpu.memory_space<vmem>>, vector<64x128xf32>,
    return
  }
}

</mosaic_0001>

<bundles_post_ra>
// kernel: tpu_custom_call.1
= control target key start
LH: loop header
LB: loop body
LE: loop exit
PB: predicated region body
PF: predicated region fallthrough
CT: control target
= control target key end

     0   :  { %s368_s0 = inlined_call_operand.vmem [shape: f32[64,32], index: 0, kind: input, shape index: {}]   ;;  %s369_s1 = inlined_call_operand.vmem [shape: f32[64,64], index: 1, kind: input, shape index: {}]   ;;  %s370_s2 = inlined_call_operand.vmem [shape: f32[32,128], index: 2, kind: input, shape index: {}]   ;;  %s371_s3 = inlined_call_operand.vmem [shape: f32[1,128], index: 3, kind: input, shape index: {}]   ;;  %s372_s4 = inlined_call_operand.hbm [shape: f32[64,128], index: 4, kind: output, shape index: {}]  }
   0x1   :  { %v29_v0 = vld [vmem:[%s370_s2 + $0x18] sm:$0xff]  ;;  %v28_v1 = vld [vmem:[%s370_s2 + $0x10] sm:$0xff]  ;;  %v27_v2 = vld [vmem:[%s370_s2 + $0x8] sm:$0xff] }
   0x2   :  { %67 = vmatpush.msra.mxu0 %v29_v0  ;;  %216 = vmatpush.msra.mxu3 %v29_v0  ;;  %v26_v3 = vld [vmem:[%s370_s2] sm:$0xff] }
   0x4   :  { %68 = vmatpush.msra.mxu0 %v28_v1  ;;  %217 = vmatpush.msra.mxu3 %v28_v1 }
   0x5   :  { %9 = vsyncpa [#allocation3], 0  ;;  %v18_v4 = vld [vmem:[%s368_s0] sm:$0xff]  ;;  %vm30_vm0 = vcmask 261120   ;;  %v23_v5 = vld [vmem:[%s368_s0 + $0x28] sm:$0xff]  ;;  %vm108_vm1 = vcmask 523264  }
   0x6   :  { %69 = vmatpush.msra.mxu0 %v27_v2  ;;  %218 = vmatpush.msra.mxu3 %v27_v2  ;;  %v19_v6 = vld [vmem:[%s368_s0 + $0x8] sm:$0xff]  ;;  %v24_v7 = vld [vmem:[%s368_s0 + $0x30] sm:$0xff]  ;;  %v25_v9 = vld [vmem:[%s368_s0 + $0x38] sm:$0xff]  ;;  %s188_s30 = sshll.u32 %s372_s4, 4  ;;  %s259_s5 = smov 128   ;;  %s189_s30 = int_to_ptr.hbm [resolvable:$true] %s188_s30 }
   0x7   :  { %v20_v8 = vld [vmem:[%s368_s0 + $0x10] sm:$0xff]  ;;  %v21_v10 = vld [vmem:[%s368_s0 + $0x18] sm:$0xff]  ;;  %v22_v11 = vld [vmem:[%s368_s0 + $0x20] sm:$0xff]  ;;  %s260_s6 = smov 8  }
   0x8   :  { %70 = vmatpush.msra.mxu0 %v26_v3  ;;  %219 = vmatpush.msra.mxu3 %v26_v3  ;;  %v100_v20 = vld [vmem:[%s369_s1 + $0x20] sm:$0xff]  ;;  %v101_v22 = vld [vmem:[%s369_s1 + $0x28] sm:$0xff]  ;;  %v102_v24 = vld [vmem:[%s369_s1 + $0x30] sm:$0xff] }
   0x9   :  { %200 = vmatmul.msk.f32.vlgmr.msra.gmra.mxu0 %vm30_vm0, %v18_v4  ;;  %205 = vmatmul.msk.f32.vlgmr.msra.gmra.mxu3 %vm30_vm0, %v23_v5  ;;  %v96_v21 = vld [vmem:[%s369_s1] sm:$0xff]  ;;  %v97_v23 = vld [vmem:[%s369_s1 + $0x8] sm:$0xff]  ;;  %v98_v25 = vld [vmem:[%s369_s1 + $0x10] sm:$0xff] }
   0xa   :  { %v103_v26 = vld [vmem:[%s369_s1 + $0x38] sm:$0xff]  ;;  %v231_v28 = vld [vmem:[%s371_s3] ss:$0 sm:$0xff] }
   0xb   :  { %v99_v27 = vld [vmem:[%s369_s1 + $0x18] sm:$0xff]  ;;  %s258_s1 = smov [#allocation2]  }
   0xc   :  { %s186_s3 = sshll.u32 %s258_s1, 4  ;;  %s187_s3 = int_to_ptr.vmem [resolvable:$true] %s186_s3 }
  0x11   :  { %201 = vmatmul.msk.f32.gmra.mxu0 %vm30_vm0, %v19_v6  ;;  %206 = vmatmul.msk.f32.gmra.mxu3 %vm30_vm0, %v24_v7 }
  0x19   :  { %202 = vmatmul.msk.f32.gmra.mxu0 %vm30_vm0, %v20_v8  ;;  %207 = vmatmul.msk.f32.gmra.mxu3 %vm30_vm0, %v25_v9 }
  0x21   :  { %203 = vmatmul.msk.f32.gmra.mxu0 %vm30_vm0, %v21_v10 }
  0x29   :  { %204 = vmatmul.msk.f32.gmra.mxu0 %vm30_vm0, %v22_v11 }
  0x86   :  { %v72_v12 = vpop.f32.mrf.mxu0 }
  0x8c   :  { %v87_v13 = vpop.f32.mrf.mxu3 }
  0x8e   :  { %v75_v14 = vpop.f32.mrf.mxu0 }
  0x94   :  { %v90_v15 = vpop.f32.mrf.mxu3 }
  0x96   :  { %v78_v16 = vpop.f32.mrf.mxu0 }
  0x9c   :  { %v93_v17 = vpop.f32.mrf.mxu3 }
  0x9d   :  { %141 = vmatpush.msra.mxu1 %v93_v17  ;;  %220 = vmatpush.msra.mxu2 %v93_v17 }
  0x9e   :  { %v81_v18 = vpop.f32.mrf.mxu0 }
  0x9f   :  { %142 = vmatpush.msra.mxu1 %v90_v15  ;;  %221 = vmatpush.msra.mxu2 %v90_v15 }
  0xa1   :  { %143 = vmatpush.msra.mxu1 %v87_v13  ;;  %222 = vmatpush.msra.mxu2 %v87_v13 }
  0xa6   :  { %v84_v19 = vpop.f32.mrf.mxu0 }
  0xa7   :  { %144 = vmatpush.msra.mxu1 %v84_v19  ;;  %223 = vmatpush.msra.mxu2 %v84_v19 }
  0xa9   :  { %145 = vmatpush.msra.mxu1 %v81_v18  ;;  %224 = vmatpush.msra.mxu2 %v81_v18 }
  0xab   :  { %146 = vmatpush.msra.mxu1 %v78_v16  ;;  %225 = vmatpush.msra.mxu2 %v78_v16 }
  0xad   :  { %147 = vmatpush.msra.mxu1 %v75_v14  ;;  %226 = vmatpush.msra.mxu2 %v75_v14 }
  0xaf   :  { %148 = vmatpush.msra.mxu1 %v72_v12  ;;  %227 = vmatpush.msra.mxu2 %v72_v12 }
  0xb0   :  { %212 = vmatmul.msk.f32.vlgmr.msra.gmra.mxu2 %vm108_vm1, %v100_v20  ;;  %208 = vmatmul.msk.f32.vlgmr.msra.gmra.mxu1 %vm108_vm1, %v96_v21 }
  0xb8   :  { %213 = vmatmul.msk.f32.gmra.mxu2 %vm108_vm1, %v101_v22  ;;  %209 = vmatmul.msk.f32.gmra.mxu1 %vm108_vm1, %v97_v23 }
  0xc0   :  { %214 = vmatmul.msk.f32.gmra.mxu2 %vm108_vm1, %v102_v24  ;;  %210 = vmatmul.msk.f32.gmra.mxu1 %vm108_vm1, %v98_v25 }
  0xc8   :  { %215 = vmatmul.msk.f32.gmra.mxu2 %vm108_vm1, %v103_v26  ;;  %211 = vmatmul.msk.f32.gmra.mxu1 %vm108_vm1, %v99_v27 }
 0x12d   :  { %v150_v29 = vpop.f32.mrf.mxu1 }
 0x12e   :  { %v151_v30 = vadd.f32 %v231_v28, %v150_v29 }
 0x130   :  { %174 = vst [vmem:[#allocation2] sm:$0xff] %v151_v30 }
 0x133   :  { %v162_v31 = vpop.f32.mrf.mxu2 }
 0x134   :  { %v163_v32 = vadd.f32 %v231_v28, %v162_v31 }
 0x135   :  { %v153_v33 = vpop.f32.mrf.mxu1 }
 0x136   :  { %178 = vst [vmem:[#allocation2 + $0x20] sm:$0xff] %v163_v32  ;;  %v154_v34 = vadd.f32 %v231_v28, %v153_v33 }
 0x138   :  { %175 = vst [vmem:[#allocation2 + $0x8] sm:$0xff] %v154_v34 }
 0x13b   :  { %v165_v35 = vpop.f32.mrf.mxu2 }
 0x13c   :  { %v166_v36 = vadd.f32 %v231_v28, %v165_v35 }
 0x13d   :  { %v156_v37 = vpop.f32.mrf.mxu1 }
 0x13e   :  { %179 = vst [vmem:[#allocation2 + $0x28] sm:$0xff] %v166_v36  ;;  %v157_v38 = vadd.f32 %v231_v28, %v156_v37 }
 0x140   :  { %176 = vst [vmem:[#allocation2 + $0x10] sm:$0xff] %v157_v38 }
 0x143   :  { %v168_v39 = vpop.f32.mrf.mxu2 }
 0x144   :  { %v169_v40 = vadd.f32 %v231_v28, %v168_v39 }
 0x145   :  { %v159_v41 = vpop.f32.mrf.mxu1 }
 0x146   :  { %180 = vst [vmem:[#allocation2 + $0x30] sm:$0xff] %v169_v40  ;;  %v160_v42 = vadd.f32 %v231_v28, %v159_v41 }
 0x148   :  { %177 = vst [vmem:[#allocation2 + $0x18] sm:$0xff] %v160_v42 }
 0x14b   :  { %v171_v43 = vpop.f32.mrf.mxu2 }
 0x14c   :  { %v172_v44 = vadd.f32 %v231_v28, %v171_v43 }
 0x14e   :  { %181 = vst [vmem:[#allocation2 + $0x38] sm:$0xff] %v172_v44 }
 0x14f   :  { %194 = dma.vmem_to_hbm [thread:$0]  %s187_s3, 1024, %s189_s30, [#allocation3], %s259_s5, %s259_s5, %s260_s6  }
 0x150   :  { %256 = dma.done.wait [#allocation3], 1024  }
 0x151   :  { %257 = vsyncadd [#allocation3], 4294966272 }
 0x152   :  { %199 = vsyncpa [#allocation3], 1 }

</bundles_post_ra>
